<compile_context>
chip_gen: v5e
topology: v5e:2x2
jax: 0.10.0
libtpu: 0.0.40
codegen_flags: <defaults>
</compile_context>

<pallas_src>
import functools

import jax
import jax.numpy as jnp
from jax.experimental import pallas as pl
from jax.experimental.pallas import tpu as pltpu


def _f32(v):
    return v if v.dtype == jnp.float32 else v.astype(jnp.float32)


def _attend(x, mt, m):
    """softmax(x @ M^T, axis=-1) @ M with f32 accumulation. x: (rows, D)."""
    logits = jnp.dot(x, mt, preferred_element_type=jnp.float32)     # (rows, mem_num)
    logits = logits - jnp.max(logits, axis=-1, keepdims=True)
    p = jnp.exp(logits)
    # Exact reciprocal keeps tight parity with the PyTorch/jnp reference;
    # pl.reciprocal(..., approx=True) is a free EUP win if ~1e-3 error is OK.
    p = p * pl.reciprocal(jnp.sum(p, axis=-1, keepdims=True), approx=False)
    return jnp.dot(p, m, preferred_element_type=jnp.float32)        # (rows, D)


def _mem_attend_kernel_packed(x_ref, mt_ref, m_ref, o_ref):
    """Lane-dense tile: each 128-lane row holds two consecutive D=64 rows."""
    x = _f32(x_ref[...])                    # (tile, 128)
    mt = _f32(mt_ref[...])                  # (64, mem_num)
    m = _f32(m_ref[...])                    # (mem_num, 64)
    lo = _attend(x[:, :64], mt, m)          # even original rows
    hi = _attend(x[:, 64:], mt, m)          # odd  original rows
    # Single lane-dense (tile, 128) store — no masked partial vst.
    o_ref[...] = jnp.concatenate([lo, hi], axis=-1).astype(o_ref.dtype)


def _mem_attend_kernel_plain(x_ref, mt_ref, m_ref, o_ref):
    """Generic fallback tile: (tile, D) rows, D on the lane axis."""
    x = _f32(x_ref[...])
    mt = _f32(mt_ref[...])
    m = _f32(m_ref[...])
    o_ref[...] = _attend(x, mt, m).astype(o_ref.dtype)


def _choose_block_rows(rows, max_block_rows):
    """Largest row-block that tiles `rows` exactly; pad only as a last resort."""
    if rows <= max_block_rows:
        return rows, 0                          # single block == full array (legal)
    start = max_block_rows - (max_block_rows % 8)
    for t in range(start, 7, -8):               # sublane-aligned exact divisors
        if rows % t == 0:
            return t, 0
    pad = (-rows) % start                       # rare fallback: one extra HBM pass
    return start, pad


@functools.partial(jax.jit, static_argnames=("max_block_rows",))
def memory_augmented_conv(x, M, *, max_block_rows=1024):
    """x: (B, T, N, D), M: (mem_num, D) -> (B, T, N, D)."""
    B, T, N, D = x.shape
    mem_num, mem_dim = M.shape
    if D != mem_dim:
        raise ValueError(f"x last dim {D} must equal mem_dim {mem_dim}")
    R = B * T * N
    Mt = M.T                                    # (D, mem_num), hoisted out of the kernel

    # Lane-dense packing: with D == 64, two feature rows fill one 128-lane row.
    packed = (D == 64) and (R % 2 == 0)
    if packed:
        rows, lanes = R // 2, 128
        kernel = _mem_attend_kernel_packed
    else:
        rows, lanes = R, D
        kernel = _mem_attend_kernel_plain
    x2 = x.reshape(rows, lanes)

    tile, pad = _choose_block_rows(rows, max_block_rows)
    if pad:
        x2 = jnp.concatenate([x2, jnp.zeros((pad, lanes), x2.dtype)], axis=0)
    rows_p = rows + pad

    out = pl.pallas_call(
        kernel,
        out_shape=jax.ShapeDtypeStruct((rows_p, lanes), x.dtype),
        grid_spec=pltpu.PrefetchScalarGridSpec(
            num_scalar_prefetch=0,
            grid=(rows_p // tile,),
            in_specs=[
                pl.BlockSpec((tile, lanes), lambda i: (i, 0)),   # x row tile
                pl.BlockSpec(Mt.shape, lambda i: (0, 0)),        # M^T resident
                pl.BlockSpec(M.shape, lambda i: (0, 0)),         # M resident
            ],
            out_specs=pl.BlockSpec((tile, lanes), lambda i: (i, 0)),
        ),
        compiler_params=pltpu.CompilerParams(
            dimension_semantics=("parallel",)),
    )(x2, Mt, M)

    if pad:
        out = out[:rows]
    # TODO(synk): nn.Dropout(0.2) is stochastic in train mode; implemented as
    # eval-mode identity here (deterministic kernel).
    return out.reshape(B, T, N, D)


def _reference(x, M):
    logits = jnp.einsum("btnd,md->btnm", x, M)
    score = jax.nn.softmax(logits, axis=-1)
    return jnp.einsum("btnm,md->btnd", score, M)


if __name__ == "__main__":
    mem_num, mem_dim = 40, 64
    B, T, N, D = 2, 4, 8, mem_dim

    key = jax.random.PRNGKey(0)
    kx, km = jax.random.split(key)

    x = jax.random.normal(kx, (B, T, N, D), dtype=jnp.float32)

    # Deterministic xavier_normal_ init: std = sqrt(2 / (fan_in + fan_out))
    xavier_std = (2.0 / (mem_num + mem_dim)) ** 0.5
    M = jax.random.normal(km, (mem_num, mem_dim), dtype=jnp.float32) * xavier_std

    out = jax.block_until_ready(memory_augmented_conv(x, M))

    ref = _reference(x, M)
    assert out.shape == (B, T, N, D)
    assert jnp.allclose(out, ref, atol=1e-5, rtol=1e-5)

    print("KERNEL_OK")
</pallas_src>

<mosaic_0001>
module attributes {stable_mosaic.version = 11 : i64} {
  func.func @_mem_attend_kernel_packed(%arg0: i32, %arg1: memref<32x128xf32, #tpu.memory_space<vmem>>, %arg2: memref<64x40xf32, #tpu.memory_space<vmem>>, %arg3: memref<40x64xf32, #tpu.memory_space<vmem>>, %arg4: memref<32x128xf32, #tpu.memory_space<vmem>>) attributes {dimension_semantics = [#tpu.dimension_semantics<parallel>], iteration_bounds = array<i64: 1>, scalar_prefetch = 0 : i64, scratch_operands = 0 : i64, tpu.core_type = #tpu.core_type<tc>, window_params = [{transform_indices = @transform_0, window_bounds = array<i64: 32, 128>}, {pipeline_mode = #tpu.pipeline_mode<synchronous>, transform_indices = @transform_1, window_bounds = array<i64: 64, 40>}, {pipeline_mode = #tpu.pipeline_mode<synchronous>, transform_indices = @transform_2, window_bounds = array<i64: 40, 64>}, {transform_indices = @transform_3, window_bounds = array<i64: 32, 128>}]} {
    %c0 = arith.constant 0 : index
    %c0_0 = arith.constant 0 : index
    %0 = vector.load %arg1[%c0, %c0_0] : memref<32x128xf32, #tpu.memory_space<vmem>>, vector<32x128xf32>
    %c0_1 = arith.constant 0 : index
    %c0_2 = arith.constant 0 : index
    %1 = vector.load %arg2[%c0_1, %c0_2] : memref<64x40xf32, #tpu.memory_space<vmem>>, vector<64x40xf32>
    %c0_3 = arith.constant 0 : index
    %c0_4 = arith.constant 0 : index
    %2 = vector.load %arg3[%c0_3, %c0_4] : memref<40x64xf32, #tpu.memory_space<vmem>>, vector<40x64xf32>
    %3 = vector.extract_strided_slice %0 {offsets = [0, 0], sizes = [32, 64], strides = [1, 1]} : vector<32x128xf32> to vector<32x64xf32>
    %cst = arith.constant dense<0.000000e+00> : vector<32x40xf32>
    %4 = tpu.matmul %3, %1, %cst {dimension_numbers = #tpu.dot_dimension_numbers<[1], [0], [0], [1], [0, 0, 1, 1], [], []>} : vector<32x64xf32>, vector<64x40xf32>, vector<32x40xf32> -> vector<32x40xf32>
    %cst_5 = arith.constant dense<0xFF800000> : vector<32xf32>
    %5 = vector.multi_reduction <maximumf>, %4, %cst_5 [1] : vector<32x40xf32> to vector<32xf32>
    %6 = vector.shape_cast %5 : vector<32xf32> to vector<32x1xf32>
    %7 = vector.broadcast %6 : vector<32x1xf32> to vector<32x40xf32>
    %8 = arith.subf %4, %7 : vector<32x40xf32>
    %9 = math.exp %8 : vector<32x40xf32>
    %cst_6 = arith.constant dense<0.000000e+00> : vector<32xf32>
    %10 = vector.multi_reduction <add>, %9, %cst_6 [1] : vector<32x40xf32> to vector<32xf32>
    %11 = vector.shape_cast %10 : vector<32xf32> to vector<32x1xf32>
    %12 = tpu.reciprocal %11 : vector<32x1xf32> -> vector<32x1xf32>
    %13 = vector.broadcast %12 : vector<32x1xf32> to vector<32x40xf32>
    %14 = arith.mulf %9, %13 : vector<32x40xf32>
    %cst_7 = arith.constant dense<0.000000e+00> : vector<32x64xf32>
    %15 = tpu.matmul %14, %2, %cst_7 {dimension_numbers = #tpu.dot_dimension_numbers<[1], [0], [0], [1], [0, 0, 1, 1], [], []>} : vector<32x40xf32>, vector<40x64xf32>, vector<32x64xf32> -> vector<32x64xf32>
    %16 = vector.extract_strided_slice %0 {offsets = [0, 64], sizes = [32, 64], strides = [1, 1]} : vector<32x128xf32> to vector<32x64xf32>
    %cst_8 = arith.constant dense<0.000000e+00> : vector<32x40xf32>
    %17 = tpu.matmul %16, %1, %cst_8 {dimension_numbers = #tpu.dot_dimension_numbers<[1], [0], [0], [1], [0, 0, 1, 1], [], []>} : vector<32x64xf32>, vector<64x40xf32>, vector<32x40xf32> -> vector<32x40xf32>
    %cst_9 = arith.constant dense<0xFF800000> : vector<32xf32>
    %18 = vector.multi_reduction <maximumf>, %17, %cst_9 [1] : vector<32x40xf32> to vector<32xf32>
    %19 = vector.shape_cast %18 : vector<32xf32> to vector<32x1xf32>
    %20 = vector.broadcast %19 : vector<32x1xf32> to vector<32x40xf32>
    %21 = arith.subf %17, %20 : vector<32x40xf32>
    %22 = math.exp %21 : vector<32x40xf32>
    %cst_10 = arith.constant dense<0.000000e+00> : vector<32xf32>
    %23 = vector.multi_reduction <add>, %22, %cst_10 [1] : vector<32x40xf32> to vector<32xf32>
    %24 = vector.shape_cast %23 : vector<32xf32> to vector<32x1xf32>
    %25 = tpu.reciprocal %24 : vector<32x1xf32> -> vector<32x1xf32>
    %26 = vector.broadcast %25 : vector<32x1xf32> to vector<32x40xf32>
    %27 = arith.mulf %22, %26 : vector<32x40xf32>
    %cst_11 = arith.constant dense<0.000000e+00> : vector<32x64xf32>
    %28 = tpu.matmul %27, %2, %cst_11 {dimension_numbers = #tpu.dot_dimension_numbers<[1], [0], [0], [1], [0, 0, 1, 1], [], []>} : vector<32x40xf32>, vector<40x64xf32>, vector<32x64xf32> -> vector<32x64xf32>
    %29 = tpu.concatenate %15, %28 in 1 : vector<32x64xf32>, vector<32x64xf32> -> vector<32x128xf32>
    %c0_12 = arith.constant 0 : index
    %c0_13 = arith.constant 0 : index
    %30 = vector.load %arg4[%c0_12, %c0_13] : memref<32x128xf32, #tpu.memory_space<vmem>>, vector<32x128xf32>
    tpu.vector_store %arg4[%c0_12, %c0_13], %29 {strides = array<i32>} : memref<32x128xf32, #tpu.memory_space<vmem>>, vector<32x128xf32>,
    return
  }
  func.func @transform_0(%arg0: i32) -> (i32, i32) {
    %c0_i32 = arith.constant 0 : i32
    %c0_i32_0 = arith.constant 0 : i32
    return %arg0, %c0_i32 : i32, i32
  }
  func.func @transform_1(%arg0: i32) -> (i32, i32) {
    %c0_i32 = arith.constant 0 : i32
    %c0_i32_0 = arith.constant 0 : i32
    %c0_i32_1 = arith.constant 0 : i32
    return %c0_i32, %c0_i32_0 : i32, i32
  }
  func.func @transform_2(%arg0: i32) -> (i32, i32) {
    %c0_i32 = arith.constant 0 : i32
    %c0_i32_0 = arith.constant 0 : i32
    %c0_i32_1 = arith.constant 0 : i32
    return %c0_i32, %c0_i32_0 : i32, i32
  }
  func.func @transform_3(%arg0: i32) -> (i32, i32) {
    %c0_i32 = arith.constant 0 : i32
    %c0_i32_0 = arith.constant 0 : i32
    return %arg0, %c0_i32 : i32, i32
  }
}

</mosaic_0001>

<bundles_post_ra>
// kernel: memory_augmented_conv.1
= control target key start
LH: loop header
LB: loop body
LE: loop exit
PB: predicated region body
PF: predicated region fallthrough
CT: control target
= control target key end

     0   :  { %s470_s16 = smov 64   ;;  %vm31_vm0 = vcmask 523264   ;;  %vm73_vm1 = vcmask 326656   ;;  %s658_s0 = inlined_call_operand.vmem [shape: f32[32,128], index: 0, kind: input, shape index: {}]   ;;  %s659_s1 = inlined_call_operand.vmem [shape: f32[64,40], index: 1, kind: input, shape index: {}]   ;;  %s660_s2 = inlined_call_operand.vmem [shape: f32[40,64], index: 2, kind: input, shape index: {}]   ;;  %s661_s3 = inlined_call_operand.vmem [shape: f32[32,128], index: 3, kind: output, shape index: {}]  }
   0x1   :  { %v14_v0 = vld [vmem:[%s658_s0] sm:$0xff]  ;;  %v16_v1 = vld [vmem:[%s658_s0 + $0x10] sm:$0xff]  ;;  %v25_v2 = vld [vmem:[%s659_s1 + $0x38] sm:$0xff] }
   0x2   :  { %211 = vrot.lane.b32.xlu0 %v14_v0, %s470_s16  ;;  %215 = vrot.lane.b32.xlu1 %v16_v1, %s470_s16  ;;  %v24_v3 = vld [vmem:[%s659_s1 + $0x30] sm:$0xff]  ;;  %v23_v4 = vld [vmem:[%s659_s1 + $0x28] sm:$0xff] }
   0x3   :  { %235 = vmatpush.msra.mxu2 %v25_v2  ;;  %52 = vmatpush.msra.mxu0 %v25_v2  ;;  %v22_v5 = vld [vmem:[%s659_s1 + $0x20] sm:$0xff]  ;;  %v15_v6 = vld [vmem:[%s658_s0 + $0x8] sm:$0xff]  ;;  %v17_v7 = vld [vmem:[%s658_s0 + $0x18] sm:$0xff] }
   0x4   :  { %v21_v8 = vld [vmem:[%s659_s1 + $0x18] sm:$0xff]  ;;  %v20_v9 = vld [vmem:[%s659_s1 + $0x10] sm:$0xff]  ;;  %v19_v10 = vld [vmem:[%s659_s1 + $0x8] sm:$0xff] }
   0x5   :  { %236 = vmatpush.msra.mxu2 %v24_v3  ;;  %53 = vmatpush.msra.mxu0 %v24_v3  ;;  %v18_v11 = vld [vmem:[%s659_s1] sm:$0xff] }
   0x7   :  { %237 = vmatpush.msra.mxu2 %v23_v4  ;;  %54 = vmatpush.msra.mxu0 %v23_v4 }
   0x9   :  { %238 = vmatpush.msra.mxu2 %v22_v5  ;;  %55 = vmatpush.msra.mxu0 %v22_v5 }
   0xa   :  { %213 = vrot.lane.b32.xlu0 %v15_v6, %s470_s16  ;;  %217 = vrot.lane.b32.xlu1 %v17_v7, %s470_s16 }
   0xb   :  { %239 = vmatpush.msra.mxu2 %v21_v8  ;;  %56 = vmatpush.msra.mxu0 %v21_v8  ;;  %v30_v8 = vld [vmem:[%s660_s2 + $0x20] sm:$0xff] }
   0xc   :  { %375 = vmatpush.msra.mxu3 %v30_v8  ;;  %193 = vmatpush.msra.mxu1 %v30_v8 }
   0xd   :  { %240 = vmatpush.msra.mxu2 %v20_v9  ;;  %57 = vmatpush.msra.mxu0 %v20_v9  ;;  %v29_v9 = vld [vmem:[%s660_s2 + $0x18] sm:$0xff] }
   0xe   :  { %376 = vmatpush.msra.mxu3 %v29_v9  ;;  %194 = vmatpush.msra.mxu1 %v29_v9 }
   0xf   :  { %241 = vmatpush.msra.mxu2 %v19_v10  ;;  %58 = vmatpush.msra.mxu0 %v19_v10  ;;  %v28_v10 = vld [vmem:[%s660_s2 + $0x10] sm:$0xff] }
  0x10   :  { %377 = vmatpush.msra.mxu3 %v28_v10  ;;  %195 = vmatpush.msra.mxu1 %v28_v10 }
  0x11   :  { %242 = vmatpush.msra.mxu2 %v18_v11  ;;  %59 = vmatpush.msra.mxu0 %v18_v11  ;;  %v27_v11 = vld [vmem:[%s660_s2 + $0x8] sm:$0xff] }
  0x12   :  { %421 = vmatmul.msk.f32.vlgmr.msra.gmra.mxu0 %vm31_vm0, %v14_v0  ;;  %378 = vmatpush.msra.mxu3 %v27_v11 }
  0x13   :  { %196 = vmatpush.msra.mxu1 %v27_v11 }
  0x1a   :  { %422 = vmatmul.msk.f32.gmra.mxu0 %vm31_vm0, %v15_v6 }
  0x22   :  { %423 = vmatmul.msk.f32.gmra.mxu0 %vm31_vm0, %v16_v1 }
  0x2a   :  { %424 = vmatmul.msk.f32.gmra.mxu0 %vm31_vm0, %v17_v7 }
  0x74   :  { %v212_v12 = vpop.permute.xlu0 %211  ;;  %v216_v14 = vpop.permute.xlu1 %215 }
  0x75   :  { %429 = vmatmul.msk.f32.vlgmr.msra.gmra.mxu2 %vm31_vm0, %v212_v12  ;;  %v26_v12 = vld [vmem:[%s660_s2] sm:$0xff] }
  0x76   :  { %379 = vmatpush.msra.mxu3 %v26_v12  ;;  %197 = vmatpush.msra.mxu1 %v26_v12 }
  0x7c   :  { %v214_v13 = vpop.permute.xlu0 %213  ;;  %v218_v15 = vpop.permute.xlu1 %217 }
  0x7d   :  { %430 = vmatmul.msk.f32.gmra.mxu2 %vm31_vm0, %v214_v13 }
  0x85   :  { %431 = vmatmul.msk.f32.gmra.mxu2 %vm31_vm0, %v216_v14 }
  0x8d   :  { %432 = vmatmul.msk.f32.gmra.mxu2 %vm31_vm0, %v218_v15 }
  0x8f   :  { %v61_v16 = vpop.f32.mrf.mxu0 }
  0x90   :  { %v74_v23 = vsel %vm73_vm1, %v61_v16, -inf }
  0x97   :  { %v64_v19 = vpop.f32.mrf.mxu0 }
  0x98   :  { %v77_v27 = vsel %vm73_vm1, %v64_v19, -inf }
  0x9f   :  { %v67_v22 = vpop.f32.mrf.mxu0 }
  0xa0   :  { %v80_v31 = vsel %vm73_vm1, %v67_v22, -inf }
  0xa7   :  { %v70_v26 = vpop.f32.mrf.mxu0 }
  0xa8   :  { %v83_v29 = vsel %vm73_vm1, %v70_v26, -inf }
  0xf8   :  { %v244_v17 = vpop.f32.mrf.mxu2 }
  0xf9   :  { %v256_v18 = vsel %vm73_vm1, %v244_v17, -inf }
  0xfa   :  { %257 = vmax.xlane.f32.xlu2 %v256_v18 }
 0x100   :  { %v247_v20 = vpop.f32.mrf.mxu2 }
 0x101   :  { %v259_v21 = vsel %vm73_vm1, %v247_v20, -inf }
 0x102   :  { %260 = vmax.xlane.f32.xlu2 %v259_v21 }
 0x108   :  { %v250_v24 = vpop.f32.mrf.mxu2 }
 0x109   :  { %v262_v25 = vsel %vm73_vm1, %v250_v24, -inf }
 0x10a   :  { %263 = vmax.xlane.f32.xlu0 %v262_v25  ;;  %75 = vmax.xlane.f32.xlu2 %v74_v23 }
 0x110   :  { %v253_v28 = vpop.f32.mrf.mxu2 }
 0x111   :  { %v265_v30 = vsel %vm73_vm1, %v253_v28, -inf }
 0x112   :  { %266 = vmax.xlane.f32.xlu1 %v265_v30  ;;  %78 = vmax.xlane.f32.xlu2 %v77_v27 }
 0x113   :  { %84 = vmax.xlane.f32.xlu0 %v83_v29 }
 0x11a   :  { %81 = vmax.xlane.f32.xlu2 %v80_v31 }
 0x16d   :  { %v258_v32 = vpop.xlane.xlu2 %257 }
 0x16e   :  { %v268_v33 = vsub.f32 %v244_v17, %v258_v32 }
 0x170   :  { %v272_v34 = vmul.f32 1.442695, %v268_v33 }
 0x172   :  { %438 = vpow2.f32 %v272_v34 }
 0x175   :  { %v261_v35 = vpop.xlane.xlu2 %260 }
 0x176   :  { %v269_v36 = vsub.f32 %v247_v20, %v261_v35 }
 0x178   :  { %v547_v37 = vpop.eup %438  ;;  %v274_v38 = vmul.f32 1.442695, %v269_v36 }
 0x179   :  { %v280_v39 = vsel %vm73_vm1, %v547_v37, 0.0 }
 0x17a   :  { %440 = vpow2.f32 %v274_v38  ;;  %281 = vadd.xlane.f32.xlu2 %v280_v39 }
 0x17d   :  { %v264_v40 = vpop.xlane.xlu0 %263  ;;  %v76_v41 = vpop.xlane.xlu2 %75 }
 0x17e   :  { %v270_v42 = vsub.f32 %v250_v24, %v264_v40  ;;  %v86_v45 = vsub.f32 %v61_v16, %v76_v41 }
 0x180   :  { %v551_v43 = vpop.eup %440  ;;  %v276_v44 = vmul.f32 1.442695, %v270_v42  ;;  %v90_v47 = vmul.f32 1.442695, %v86_v45 }
 0x181   :  { %v283_v46 = vsel %vm73_vm1, %v551_v43, 0.0 }
 0x182   :  { %442 = vpow2.f32 %v276_v44  ;;  %284 = vadd.xlane.f32.xlu2 %v283_v46 }
 0x183   :  { %444 = vpow2.f32 %v90_v47 }
 0x185   :  { %v267_v48 = vpop.xlane.xlu1 %266  ;;  %v79_v49 = vpop.xlane.xlu2 %78 }
 0x186   :  { %v271_v50 = vsub.f32 %v253_v28, %v267_v48  ;;  %v87_v51 = vsub.f32 %v64_v19, %v79_v49  ;;  %v85_v52 = vpop.xlane.xlu0 %84 }
 0x187   :  { %v89_v56 = vsub.f32 %v70_v26, %v85_v52 }
 0x188   :  { %v555_v53 = vpop.eup %442  ;;  %v278_v54 = vmul.f32 1.442695, %v271_v50  ;;  %v92_v55 = vmul.f32 1.442695, %v87_v51 }
 0x189   :  { %v286_v57 = vsel %vm73_vm1, %v555_v53, 0.0  ;;  %v96_v58 = vmul.f32 1.442695, %v89_v56  ;;  %v559_v60 = vpop.eup %444 }
 0x18a   :  { %446 = vpow2.f32 %v278_v54  ;;  %287 = vadd.xlane.f32.xlu2 %v286_v57  ;;  %v98_v2 = vsel %vm73_vm1, %v559_v60, 0.0 }
 0x18b   :  { %448 = vpow2.f32 %v92_v55 }
 0x18c   :  { %450 = vpow2.f32 %v96_v58 }
 0x18d   :  { %v82_v59 = vpop.xlane.xlu2 %81 }
 0x18e   :  { %v88_v61 = vsub.f32 %v67_v22, %v82_v59 }
 0x190   :  { %v561_v62 = vpop.eup %446  ;;  %v94_v63 = vmul.f32 1.442695, %v88_v61 }
 0x191   :  { %v563_v0 = vpop.eup %448  ;;  %v289_v1 = vsel %vm73_vm1, %v561_v62, 0.0 }
 0x192   :  { %452 = vpow2.f32 %v94_v63  ;;  %290 = vadd.xlane.f32.xlu1 %v289_v1  ;;  %99 = vadd.xlane.f32.xlu2 %v98_v2  ;;  %v101_v3 = vsel %vm73_vm1, %v563_v0, 0.0  ;;  %v571_v4 = vpop.eup %450 }
 0x193   :  { %102 = vadd.xlane.f32.xlu0 %v101_v3  ;;  %v107_v7 = vsel %vm73_vm1, %v571_v4, 0.0 }
 0x198   :  { %v573_v5 = vpop.eup %452 }
 0x199   :  { %v104_v6 = vsel %vm73_vm1, %v573_v5, 0.0 }
 0x19a   :  { %105 = vadd.xlane.f32.xlu1 %v104_v6  ;;  %108 = vadd.xlane.f32.xlu2 %v107_v7 }
 0x1ed   :  { %v282_v13 = vpop.xlane.xlu2 %281 }
 0x1ee   :  { %454 = vrcp.f32 %v282_v13  ;;  %v303_v18 = vand.u32 2147483648, %v282_v13  ;;  %v301_v20 = vand.u32 2147483647, %v282_v13  ;;  %vm297_vm3 = vweird.f32 %v282_v13 }
 0x1f0   :  { %v304_v23 = vor.u32 1.1754944e-38, %v303_v18  ;;  %vm302_vm5 = vcmp.eq.f32.partialorder %v301_v20, 8.507059e+37 }
 0x1f4   :  { %v455_v14 = vpop.eup %454 }
 0x1f5   :  { %v293_v15 = vmul.f32 %v455_v14, %v282_v13  ;;  %v285_v16 = vpop.xlane.xlu2 %284  ;;  %vm298_vm2 = vweird.f32 %v455_v14 }
 0x1f6   :  { %456 = vrcp.f32 %v285_v16  ;;  %vm299_vm4 = vmor %vm297_vm3, %vm298_vm2  ;;  %v317_v31 = vand.u32 2147483648, %v285_v16  ;;  %vm311_vm7 = vweird.f32 %v285_v16  ;;  %v315_v33 = vand.u32 2147483647, %v285_v16 }
 0x1f7   :  { %v294_v17 = vsub.f32 1.0, %v293_v15 }
 0x1f8   :  { %v318_v40 = vor.u32 1.1754944e-38, %v317_v31  ;;  %vm316_vm9 = vcmp.eq.f32.partialorder %v315_v33, 8.507059e+37 }
 0x1f9   :  { %v295_v19 = vmul.f32 %v455_v14, %v294_v17 }
 0x1fb   :  { %v296_v21 = vadd.f32 %v455_v14, %v295_v19 }
 0x1fc   :  { %v457_v22 = vpop.eup %456 }
 0x1fd   :  { %v307_v24 = vmul.f32 %v457_v22, %v285_v16  ;;  %v288_v25 = vpop.xlane.xlu2 %287  ;;  %v300_v26 = vsel %vm299_vm4, %v455_v14, %v296_v21  ;;  %vm312_vm6 = vweird.f32 %v457_v22 }
 0x1fe   :  { %458 = vrcp.f32 %v288_v25  ;;  %v305_v27 = vsel %vm302_vm5, %v304_v23, %v300_v26  ;;  %vm313_vm8 = vmor %vm311_vm7, %vm312_vm6  ;;  %v331_v45 = vand.u32 2147483648, %v288_v25  ;;  %v329_v47 = vand.u32 2147483647, %v288_v25 }
 0x1ff   :  { %v308_v28 = vsub.f32 1.0, %v307_v24  ;;  %v348_v29 = vmul.f32 %v547_v37, %v305_v27  ;;  %vm325_vm11 = vweird.f32 %v288_v25 }
 0x200   :  { %v332_v52 = vor.u32 1.1754944e-38, %v331_v45  ;;  %vm330_vm13 = vcmp.eq.f32.partialorder %v329_v47, 8.507059e+37 }
 0x201   :  { %v309_v30 = vmul.f32 %v457_v22, %v308_v28  ;;  %433 = vmatmul.msk.f32.vlgmr.msra.gmra.mxu3 %vm73_vm1, %v348_v29 }
 0x203   :  { %v310_v32 = vadd.f32 %v457_v22, %v309_v30 }
 0x204   :  { %v459_v34 = vpop.eup %458 }
 0x205   :  { %v321_v35 = vmul.f32 %v459_v34, %v288_v25  ;;  %v291_v36 = vpop.xlane.xlu1 %290  ;;  %v100_v38 = vpop.xlane.xlu2 %99  ;;  %v314_v39 = vsel %vm313_vm8, %v457_v22, %v310_v32  ;;  %vm326_vm10 = vweird.f32 %v459_v34 }
 0x206   :  { %460 = vrcp.f32 %v291_v36  ;;  %v596_v41 = vpop.xlane.xlu0 %102  ;;  %v319_v37 = vsel %vm316_vm9, %v318_v40, %v314_v39  ;;  %vm601_vm12 = vmor %vm325_vm11, %vm326_vm10  ;;  %v345_v57 = vand.u32 2147483648, %v291_v36  ;;  %v121_v63 = vand.u32 2147483648, %v100_v38 }
 0x207   :  { %v322_v42 = vsub.f32 1.0, %v321_v35  ;;  %462 = vrcp.f32 %v100_v38  ;;  %v349_v46 = vmul.f32 %v551_v43, %v319_v37  ;;  %v119_v2 = vand.u32 2147483647, %v100_v38 }
 0x208   :  { %464 = vrcp.f32 %v596_v41  ;;  %v343_v7 = vand.u32 2147483647, %v291_v36  ;;  %vm339_vm2 = vweird.f32 %v291_v36  ;;  %v346_v15 = vor.u32 1.1754944e-38, %v345_v57 }
 0x209   :  { %v323_v44 = vmul.f32 %v459_v34, %v322_v42  ;;  %434 = vmatmul.msk.f32.gmra.mxu3 %vm73_vm1, %v349_v46  ;;  %vm115_vm3 = vweird.f32 %v100_v38  ;;  %v122_v16 = vor.u32 1.1754944e-38, %v121_v63  ;;  %vm120_vm6 = vcmp.eq.f32.partialorder %v119_v2, 8.507059e+37 }
 0x20a   :  { %vm344_vm7 = vcmp.eq.f32.partialorder %v343_v7, 8.507059e+37  ;;  %v135_v23 = vand.u32 2147483648, %v596_v41  ;;  %vm129_vm9 = vweird.f32 %v596_v41  ;;  %v133_v28 = vand.u32 2147483647, %v596_v41 }
 0x20b   :  { %v324_v48 = vadd.f32 %v459_v34, %v323_v44 }
 0x20c   :  { %v461_v49 = vpop.eup %460  ;;  %v136_v32 = vor.u32 1.1754944e-38, %v135_v23  ;;  %vm134_vm11 = vcmp.eq.f32.partialorder %v133_v28, 8.507059e+37 }
 0x20d   :  { %v463_v51 = vpop.eup %462  ;;  %v335_v54 = vmul.f32 %v461_v49, %v291_v36  ;;  %v605_v55 = vpop.xlane.xlu1 %105  ;;  %v328_v56 = vsel %vm601_vm12, %v459_v34, %v324_v48  ;;  %vm340_vm14 = vweird.f32 %v461_v49 }
 0x20e   :  { %v465_v43 = vpop.eup %464  ;;  %v111_v58 = vmul.f32 %v463_v51, %v100_v38  ;;  %466 = vrcp.f32 %v605_v55  ;;  %v610_v59 = vpop.xlane.xlu2 %108  ;;  %v333_v6 = vsel %vm330_vm13, %v332_v52, %v328_v56  ;;  %vm116_vm15 = vweird.f32 %v463_v51  ;;  %vm341_vm4 = vmor %vm339_vm2, %vm340_vm14 }
 0x20f   :  { %v336_v61 = vsub.f32 1.0, %v335_v54  ;;  %v125_v1 = vmul.f32 %v465_v43, %v596_v41  ;;  %468 = vrcp.f32 %v610_v59  ;;  %v350_v10 = vmul.f32 %v555_v53, %v333_v6  ;;  %vm117_vm5 = vmor %vm115_vm3, %vm116_vm15 }
 0x210   :  { %v112_v3 = vsub.f32 1.0, %v111_v58  ;;  %vm130_vm8 = vweird.f32 %v465_v43  ;;  %v149_v35 = vand.u32 2147483648, %v605_v55  ;;  %vm143_vm13 = vweird.f32 %v605_v55 }
 0x211   :  { %v337_v8 = vmul.f32 %v461_v49, %v336_v61  ;;  %v126_v9 = vsub.f32 1.0, %v125_v1  ;;  %435 = vmatmul.msk.f32.gmra.mxu3 %vm73_vm1, %v350_v10  ;;  %vm131_vm10 = vmor %vm129_vm9, %vm130_vm8  ;;  %v147_v36 = vand.u32 2147483647, %v605_v55  ;;  %v163_v37 = vand.u32 2147483648, %v610_v59 }
 0x212   :  { %v113_v11 = vmul.f32 %v463_v51, %v112_v3  ;;  %v150_v40 = vor.u32 1.1754944e-38, %v149_v35  ;;  %vm157_vm3 = vweird.f32 %v610_v59 }
 0x213   :  { %v127_v12 = vmul.f32 %v465_v43, %v126_v9  ;;  %v338_v13 = vadd.f32 %v461_v49, %v337_v8  ;;  %vm148_vm15 = vcmp.eq.f32.partialorder %v147_v36, 8.507059e+37  ;;  %v164_v46 = vor.u32 1.1754944e-38, %v163_v37 }
 0x214   :  { %v467_v14 = vpop.eup %466  ;;  %v114_v17 = vadd.f32 %v463_v51, %v113_v11 }
 0x215   :  { %v139_v18 = vmul.f32 %v467_v14, %v605_v55  ;;  %v342_v19 = vsel %vm341_vm4, %v461_v49, %v338_v13  ;;  %v128_v21 = vadd.f32 %v465_v43, %v127_v12  ;;  %v469_v22 = vpop.eup %468  ;;  %vm144_vm12 = vweird.f32 %v467_v14 }
 0x216   :  { %v118_v53 = vsel %vm117_vm5, %v463_v51, %v114_v17  ;;  %v347_v20 = vsel %vm344_vm7, %v346_v15, %v342_v19  ;;  %v153_v30 = vmul.f32 %v469_v22, %v610_v59  ;;  %vm145_vm14 = vmor %vm143_vm13, %vm144_vm12  ;;  %vm158_vm2 = vweird.f32 %v469_v22 }
 0x217   :  { %v140_v24 = vsub.f32 1.0, %v139_v18  ;;  %v123_v25 = vsel %vm120_vm6, %v122_v16, %v118_v53  ;;  %v351_v26 = vmul.f32 %v561_v62, %v347_v20  ;;  %v132_v31 = vsel %vm131_vm10, %v465_v43, %v128_v21  ;;  %vm159_vm4 = vmor %vm157_vm3, %vm158_vm2 }
 0x218   :  { %v166_v27 = vmul.f32 %v559_v60, %v123_v25  ;;  %v137_v33 = vsel %vm134_vm11, %v136_v32, %v132_v31  ;;  %v154_v34 = vsub.f32 1.0, %v153_v30 }
 0x219   :  { %v141_v29 = vmul.f32 %v467_v14, %v140_v24  ;;  %436 = vmatmul.msk.f32.gmra.mxu3 %vm73_vm1, %v351_v26  ;;  %v167_v60 = vmul.f32 %v563_v0, %v137_v33  ;;  %v161_v0 = vand.u32 2147483647, %v610_v59 }
 0x21a   :  { %425 = vmatmul.msk.f32.vlgmr.msra.gmra.mxu1 %vm73_vm1, %v166_v27  ;;  %v155_v38 = vmul.f32 %v469_v22, %v154_v34 }
 0x21b   :  { %v142_v62 = vadd.f32 %v467_v14, %v141_v29  ;;  %vm162_vm5 = vcmp.eq.f32.partialorder %v161_v0, 8.507059e+37 }
 0x21c   :  { %v156_v42 = vadd.f32 %v469_v22, %v155_v38 }
 0x21d   :  { %v146_v39 = vsel %vm145_vm14, %v467_v14, %v142_v62 }
 0x21e   :  { %v151_v41 = vsel %vm148_vm15, %v150_v40, %v146_v39  ;;  %v160_v45 = vsel %vm159_vm4, %v469_v22, %v156_v42 }
 0x21f   :  { %v168_v44 = vmul.f32 %v573_v5, %v151_v41  ;;  %v165_v47 = vsel %vm162_vm5, %v164_v46, %v160_v45 }
 0x220   :  { %v169_v48 = vmul.f32 %v571_v4, %v165_v47 }
 0x222   :  { %426 = vmatmul.msk.f32.gmra.mxu1 %vm73_vm1, %v167_v60 }
 0x22a   :  { %427 = vmatmul.msk.f32.gmra.mxu1 %vm73_vm1, %v168_v44 }
 0x232   :  { %428 = vmatmul.msk.f32.gmra.mxu1 %vm73_vm1, %v169_v48 }
 0x284   :  { %v381_v49 = vpop.f32.mrf.mxu3 }
 0x285   :  { %397 = vrot.lane.b32.xlu0 %v381_v49, %s470_s16 }
 0x28c   :  { %v384_v50 = vpop.f32.mrf.mxu3 }
 0x28d   :  { %399 = vrot.lane.b32.xlu1 %v384_v50, %s470_s16 }
 0x294   :  { %v387_v5 = vpop.f32.mrf.mxu3 }
 0x295   :  { %401 = vrot.lane.b32.xlu2 %v387_v5, %s470_s16 }
 0x297   :  { %v199_v52 = vpop.f32.mrf.mxu1 }
 0x29c   :  { %v390_v51 = vpop.f32.mrf.mxu3 }
 0x29d   :  { %403 = vrot.lane.b32.xlu0 %v390_v51, %s470_s16 }
 0x29f   :  { %v202_v54 = vpop.f32.mrf.mxu1 }
 0x2a7   :  { %v205_v55 = vpop.f32.mrf.mxu1 }
 0x2af   :  { %v208_v61 = vpop.f32.mrf.mxu1 }
 0x2ef   :  { %v402_v56 = vpop.permute.xlu2 %401 }
 0x2f0   :  { %v411_v4 = vsel %vm31_vm0, %v205_v55, %v402_v56 }
 0x2f1   :  { %415 = vst [vmem:[%s661_s3 + $0x10] sm:$0xff] %v411_v4 }
 0x2f7   :  { %v398_v43 = vpop.permute.xlu0 %397 }
 0x2f8   :  { %v409_v57 = vsel %vm31_vm0, %v199_v52, %v398_v43 }
 0x2f9   :  { %413 = vst [vmem:[%s661_s3] sm:$0xff] %v409_v57 }
 0x2ff   :  { %v400_v58 = vpop.permute.xlu1 %399 }
 0x300   :  { %v410_v59 = vsel %vm31_vm0, %v202_v54, %v400_v58 }
 0x301   :  { %414 = vst [vmem:[%s661_s3 + $0x8] sm:$0xff] %v410_v59 }
 0x30f   :  { %v404_v63 = vpop.permute.xlu0 %403 }
 0x310   :  { %v412_v1 = vsel %vm31_vm0, %v208_v61, %v404_v63 }
 0x311   :  { %416 = vst [vmem:[%s661_s3 + $0x18] sm:$0xff] %v412_v1 }

</bundles_post_ra>
